<compile_context>
chip_gen: v7x
topology: tpu7x:2x2x1
jax: 0.10.0
libtpu: 0.0.40
codegen_flags: <defaults>
</compile_context>

<pallas_src>
import jax
import jax.numpy as jnp
from jax.experimental import pallas as pl
from jax.experimental.pallas import tpu as pltpu


def _shuffle_copy_kernel(x_ref, o_ref):
    # x_ref: (Nb, 1, cpg, Sc) slab of one channel group in the input layout.
    # o_ref: (Nb, cpg, Sc)    the same bytes in the shuffled output layout.
    # The two block views hold identical data element-for-element, so this is a copy.
    o_ref[...] = x_ref[...].reshape(o_ref.shape)


def channel_shuffle_ref(x, groups):
    """Pure-JAX reference mirroring the PyTorch forward exactly."""
    N, C, D, H, W = x.shape
    cpg = C // groups
    y = x.reshape(N, groups, cpg, D, H, W)
    y = jnp.transpose(y, (0, 2, 1, 3, 4, 5))
    return y.reshape(N, C, D, H, W)


# Per-block VMEM cap (single buffer, padding included). With double-buffered input +
# output this stays ~4x the cap, comfortably inside v5e/v6e/v7x budgets.
_BLOCK_BYTES_CAP = 4 * 1024 * 1024
_MIN_PALLAS_BYTES = 64 * 1024             # below this, launch/step overhead dominates


def _sublane_pack(itemsize):
    """Rows per VMEM sublane tile for a given dtype width (8 f32 / 16 bf16 / 32 int8)."""
    return max(8, (8 * 4) // max(1, itemsize))


def _pick_spatial_chunk(padded_cpg, S, itemsize, cap):
    """Largest Sc dividing S, multiple of 128, with padded_cpg*Sc*itemsize <= cap."""
    if padded_cpg * S * itemsize <= cap:
        return S
    for n in range(2, S // 128 + 1):
        if S % n:
            continue
        sc = S // n
        if sc % 128:
            continue
        if padded_cpg * sc * itemsize <= cap:
            return sc
    return None


def _pick_batch_chunk(N, per_image_bytes, cap):
    """Largest divisor Nb of N with Nb * per_image_bytes <= cap."""
    best = 1
    for nb in range(1, N + 1):
        if N % nb:
            continue
        if nb * per_image_bytes <= cap:
            best = nb
    return best


def channel_shuffle(x, groups, *, use_pallas=None, block_bytes_cap=_BLOCK_BYTES_CAP):
    """Channel shuffle for x: (N, C, D, H, W). Returns same shape/dtype."""
    N, C, D, H, W = x.shape
    assert C % groups == 0, "channels must be divisible by groups"
    cpg = C // groups

    # groups == 1 or cpg == 1 -> the shuffle is the identity permutation.
    if groups == 1 or cpg == 1:
        return x

    S = D * H * W
    itemsize = jnp.dtype(x.dtype).itemsize

    if use_pallas is None:
        use_pallas = x.size * itemsize >= _MIN_PALLAS_BYTES

    # Pallas path wants 128-aligned spatial chunks for unmasked lane stores; otherwise
    # the XLA transpose is already at roofline for a copy of this shape.
    if (not use_pallas) or (S % 128 != 0):
        return channel_shuffle_ref(x, groups)

    padded_cpg = -(-cpg // _sublane_pack(itemsize)) * _sublane_pack(itemsize)

    Sc = _pick_spatial_chunk(padded_cpg, S, itemsize, block_bytes_cap)
    if Sc is None:  # pathological cpg; fall back rather than blow VMEM
        return channel_shuffle_ref(x, groups)
    n_sc = S // Sc

    # If one (cpg, S) group slab is small, pack several batch images per block so each
    # grid step moves more bytes (fewer steps on this purely mem-bound copy).
    Nb = 1
    if n_sc == 1:
        Nb = _pick_batch_chunk(N, padded_cpg * S * itemsize, block_bytes_cap)

    padded_block_bytes = Nb * padded_cpg * Sc * itemsize
    # input + output, double-buffered, plus headroom; clamp to v7x physical VMEM.
    vmem_limit = min(64 * 1024 * 1024,
                     max(16 * 1024 * 1024, 4 * padded_block_bytes + 4 * 1024 * 1024))

    # Input viewed as (N, groups, cpg, S): each group's cpg channels are contiguous.
    xi = x.reshape(N, groups, cpg, S)

    # Output produced directly in the shuffled layout (N, cpg, groups*S):
    #   out_flat[n, j, k*S + s] == x[n, k*cpg + j, s]
    # so the final reshape to (N, C, D, H, W) is the ChannelShuffle result for free.
    out_flat = pl.pallas_call(
        _shuffle_copy_kernel,
        out_shape=jax.ShapeDtypeStruct((N, cpg, groups * S), x.dtype),
        grid=(N // Nb, groups, n_sc),
        in_specs=[pl.BlockSpec((Nb, 1, cpg, Sc),
                               lambda n, k, sc: (n, k, 0, sc))],
        out_specs=pl.BlockSpec((Nb, cpg, Sc),
                               lambda n, k, sc: (n, 0, k * n_sc + sc)),
        compiler_params=pltpu.CompilerParams(
            dimension_semantics=("parallel", "parallel", "parallel"),
            vmem_limit_bytes=vmem_limit),
    )(xi)

    return out_flat.reshape(N, C, D, H, W)


if __name__ == "__main__":
    key = jax.random.PRNGKey(0)

    # Case 1: Pallas path with batch packing (Nb=2). S = 4*8*16 = 512 (mult of 128), cpg=8.
    groups = 4
    x = jax.random.normal(key, (2, 32, 4, 8, 16), dtype=jnp.float32)
    out = jax.block_until_ready(channel_shuffle(x, groups, use_pallas=True))
    ref = channel_shuffle_ref(x, groups)
    assert out.shape == ref.shape and out.dtype == ref.dtype
    assert jnp.array_equal(out, ref), "Pallas channel shuffle mismatch vs reference"

    # Case 2: tiny config (groups=2, C=4, cpg=2) through the Pallas path.
    x2 = jax.random.normal(jax.random.PRNGKey(1), (2, 4, 4, 8, 16), dtype=jnp.float32)
    out2 = jax.block_until_ready(channel_shuffle(x2, 2, use_pallas=True))
    assert jnp.array_equal(out2, channel_shuffle_ref(x2, 2)), "mismatch on tiny config"

    # Case 3: force spatial chunking (n_sc > 1) with a small block cap, bf16 dtype.
    x3 = jax.random.normal(jax.random.PRNGKey(2), (2, 16, 4, 8, 32), dtype=jnp.bfloat16)
    out3 = jax.block_until_ready(
        channel_shuffle(x3, 4, use_pallas=True, block_bytes_cap=16 * 1024))
    assert jnp.array_equal(out3, channel_shuffle_ref(x3, 4)), "mismatch on chunked bf16"

    # Case 4: non-128-aligned spatial size dispatches to the XLA reference path.
    x4 = jax.random.normal(jax.random.PRNGKey(3), (2, 8, 3, 5, 7), dtype=jnp.float32)
    out4 = jax.block_until_ready(channel_shuffle(x4, 2, use_pallas=True))
    assert jnp.array_equal(out4, channel_shuffle_ref(x4, 2)), "mismatch on fallback path"

    print("KERNEL_OK")
</pallas_src>

<mosaic_0001>
module attributes {stable_mosaic.version = 11 : i64} {
  func.func @_shuffle_copy_kernel(%arg0: i32, %arg1: i32, %arg2: i32, %arg3: memref<2x1x8x512xf32, #tpu.memory_space<vmem>>, %arg4: memref<2x8x512xf32, #tpu.memory_space<vmem>>) attributes {dimension_semantics = [#tpu.dimension_semantics<parallel>, #tpu.dimension_semantics<parallel>, #tpu.dimension_semantics<parallel>], iteration_bounds = array<i64: 1, 4, 1>, scalar_prefetch = 0 : i64, scratch_operands = 0 : i64, tpu.core_type = #tpu.core_type<tc>, window_params = [{transform_indices = @transform_0, window_bounds = array<i64: 2, 1, 8, 512>}, {transform_indices = @transform_1, window_bounds = array<i64: 2, 8, 512>}]} {
    %c0 = arith.constant 0 : index
    %c0_0 = arith.constant 0 : index
    %c0_1 = arith.constant 0 : index
    %c0_2 = arith.constant 0 : index
    %0 = vector.load %arg3[%c0, %c0_0, %c0_1, %c0_2] : memref<2x1x8x512xf32, #tpu.memory_space<vmem>>, vector<2x1x8x512xf32>
    %1 = vector.shape_cast %0 : vector<2x1x8x512xf32> to vector<2x8x512xf32>
    %c0_3 = arith.constant 0 : index
    %c0_4 = arith.constant 0 : index
    %c0_5 = arith.constant 0 : index
    %2 = vector.load %arg4[%c0_3, %c0_4, %c0_5] : memref<2x8x512xf32, #tpu.memory_space<vmem>>, vector<2x8x512xf32>
    tpu.vector_store %arg4[%c0_3, %c0_4, %c0_5], %1 {strides = array<i32>} : memref<2x8x512xf32, #tpu.memory_space<vmem>>, vector<2x8x512xf32>,
    return
  }
  func.func @transform_0(%arg0: i32, %arg1: i32, %arg2: i32) -> (i32, i32, i32, i32) {
    %c0_i32 = arith.constant 0 : i32
    %c0_i32_0 = arith.constant 0 : i32
    return %arg0, %arg1, %c0_i32, %arg2 : i32, i32, i32, i32
  }
  func.func @transform_1(%arg0: i32, %arg1: i32, %arg2: i32) -> (i32, i32, i32) {
    %c1_i32 = arith.constant 1 : i32
    %0 = arith.muli %arg1, %c1_i32 : i32
    %1 = arith.addi %0, %arg2 : i32
    %c0_i32 = arith.constant 0 : i32
    %c0_i32_0 = arith.constant 0 : i32
    return %arg0, %c0_i32, %1 : i32, i32, i32
  }
}

</mosaic_0001>

<bundles_post_ra>
// kernel: tpu_custom_call.1
= control target key start
LH: loop header
LB: loop body
LE: loop exit
PB: predicated region body
PF: predicated region fallthrough
CT: control target
= control target key end

     0   :  { %6 = vsyncpa [#allocation3], 0  ;;  %s687_s0 = inlined_call_operand.hbm [shape: f32[2,4,8,512], index: 0, kind: input, shape index: {}]   ;;  %s688_s1 = inlined_call_operand.hbm [shape: f32[2,8,2048], index: 1, kind: output, shape index: {}]  }
   0x1   :  { %8 = vsyncpa [#allocation3 + $0x1], 0 }
   0x2   :  { %9 = vsyncpa [#allocation4], 0 }
   0x3   :  { %11 = vsyncpa [#allocation4 + $0x1], 0  ;;  %s516_s6 = smov 0   ;;  %s518_s7 = smov 0  }
   0x4   :  { %s520_s8 = smov 0   ;;  %s522_s9 = smov 0  }
   0x5   :  { %s524_s10 = smov 0   ;;  %s526_s11 = smov 0  }
   0x6 LB: > { %s299_s12 = sadd.s32 4294967295, %s496_s11   ;;  %s300_s13 = sadd.s32 4294967294, %s496_s11   ;;  %s496_s11 = sphi %s526_s11, %s17_s11   ;;  %s492_s10 = sphi %s524_s10, %s701_s10   ;;  %s488_s9 = sphi %s522_s9, %s700_s9   ;;  %s484_s8 = sphi %s520_s8, %s699_s8   ;;  %s480_s7 = sphi %s518_s7, %s698_s7   ;;  %s476_s6 = sphi %s516_s6, %s697_s6  }
   0x7   : > { %s32_s14 = sadd.s32 1, %s492_s10  ;;  %s47_s15 = sadd.s32 1, %s484_s8 }
   0x8   : > { %p34_p0 = scmp.ge.s32.totalorder %s32_s14, 4  ;;  %p54_p1 = scmp.ne.s32.totalorder %s484_s8, %s480_s7 }
   0x9   : > { %p55_p2 = scmp.eq.s32.totalorder %s496_s11, 0  ;;  %p60_p3 = scmp.ne.s32.totalorder %s480_s7, %s476_s6 }
   0xa   : > { %s703_s14 = smov (%p34_p0, %s32_s14), 0  ;;  %p61_p5 = scmp.eq.s32.totalorder %s299_s12, 0 }
   0xb   : > { %p557_p4 = por %p55_p2, %p54_p1  ;;  %s41_s17 = ssub.s32 %s492_s10, %s703_s14 }
   0xc   : > { %p88_p6 = scmp.eq.s32.totalorder %s299_s12, 3  ;;  %p45_p7 = scmp.eq.s32.totalorder %s41_s17, 0 }
   0xd   : > { %p563_p8 = por %p61_p5, %p60_p3  ;;  %p94_p10 = scmp.eq.s32.totalorder %s300_s13, 3 }
   0xe   : > { %p567_p9 = por %p88_p6, %p54_p1  ;;  %p328_p12 = scmp.lt.s32.totalorder %s496_s11, 4 }
   0xf   : > { %s572_s20 = scalar_select %p45_p7, %s484_s8, %s47_s15  }
  0x10   : > { %s692_s19 = scalar_select %p567_p9, 1, 0 }
  0x11   : > { %p574_p11 = por %p94_p10, %p60_p3  ;;  %s114_s22 = sand.u32 1, %s484_s8  }
  0x12   : > { %s303_s23 = sshll.u32 %s114_s22, 6  ;;  %s314_s24 = sshll.u32 %s492_s10, 9 }
  0x13   : > { %s693_s21 = scalar_select %p574_p11, 1, 0 }
  0x14   : > { %s584_s27 = scalar_lea.hbm %s687_s0, %s314_s24  ;;  %s118_s28 = scalar_lea.vmem [#allocation2], %s303_s23 }
  0x15   : > { %s130_s29 = sshll.u32 %s118_s28, 4  ;;  %p590_p13 = pnand %p328_p12, %p557_p4  ;;  %s586_s29 = int_to_ptr.vmem [resolvable:$true] %s130_s29 }
  0x16   : > { %s594_s2 = scalar_lea.sflag [#allocation3], %s114_s22  ;;  %s384_s3 = scalar_lea.hbm %s584_s27, 1024 }
  0x17   : > { %p385_p0 = scmp.ne.s32.totalorder %s584_s27, %s384_s3  ;;  %p386_p1 = pneg %p590_p13 }
  0x18   : > { %s389_s12 = scalar_lea.hbm %s687_s0, 4096  ;;  %p390_p4 = scmp.lt.u32.totalorder %s584_s27, %s687_s0 }
  0x19   : > { %p387_p2 = pnand %p386_p1, %p385_p0  ;;  %p391_p5 = scmp.lt.u32.totalorder %s389_s12, %s384_s3 }
  0x1a   : > { %p393_p7 = scmp.lt.u32.totalorder %s384_s3, %s584_s27 }
  0x1b   : > { %p388_p3 = pneg %p387_p2  ;;  %p392_p6 = por %p391_p5, %p390_p4 }
  0x1d   : > { %p394_p10 = por %p393_p7, %p392_p6 }
  0x1f   : > { %p395_p12 = pnand %p394_p10, %p388_p3 }
  0x21   : > { %398 = shalt.err (!%p395_p12)
}
  0x22   : > { %s399_s16 = scalar_lea.vmem %s586_s29, 1024  ;;  %s498_s17 = smov [#allocation2]  }
  0x23   : > { %p400_p0 = scmp.ne.s32.totalorder %s586_s29, %s399_s16  ;;  %s404_s22 = sshll.u32 %s498_s17, 4  ;;  %s405_s22 = int_to_ptr.vmem [resolvable:$false] %s404_s22 }
  0x24   : > { %s406_s23 = scalar_lea.vmem %s405_s22, 2048  ;;  %p407_p9 = scmp.lt.s32.totalorder %s586_s29, %s405_s22 }
  0x25   : > { %p402_p2 = pnand %p400_p0, %p386_p1  ;;  %p408_p4 = scmp.lt.s32.totalorder %s406_s23, %s399_s16 }
  0x27   : > { %p403_p11 = pneg %p402_p2  ;;  %p409_p5 = por %p408_p4, %p407_p9 }
  0x29   : > { %p410_p6 = pnand %p409_p5, %p403_p11 }
  0x2b   : > { %413 = shalt.err (!%p410_p6)
}
  0x2c   : > { %s499_s24 = smov 2048   ;;  %s500_s25 = smov 512  }
  0x2d   : > { %s501_s26 = smov 32   ;;  %p306_p1 = scmp.ge.s32.totalorder %s496_s11, 1 }
  0x2e   : > { %323 = dma.hbm_to_vmem [thread:$0]  (!%p590_p13), %s584_s27, 1024, %s586_s29, %s594_s2, %s499_s24, %s500_s25, %s501_s26  }
  0x2f   : > { %p138_p3 = scmp.lt.s32.totalorder %s496_s11, 5 }
  0x31   : > { %p139_p7 = pnand %p306_p1, %p138_p3 }
  0x32   : > { %s625_s28 = sand.u32 (!%p139_p7), 1, %s480_s7  }
  0x33   : > { %142 = sbr.rel (%p139_p7) target bundleno = 87 (0x57), region = 24  ;;  %s307_s3 = sshll.u32 (!%p139_p7), %s625_s28, 6 }
  0x34   : > { %s145_s4 = scalar_lea.sflag (!%p139_p7), [#allocation3], %s625_s28  ;;  %s148_s5 = scalar_lea.vmem (!%p139_p7), [#allocation2], %s307_s3 }
  0x3a   : > { %467 = dma.done.wait (%p563_p8), %s145_s4, 1024  }
  0x3b   : > { %469 = vsyncadd (%p563_p8), %s145_s4, 4294966272  ;;  %s166_s27 = scalar_lea.vmem [#allocation5], %s307_s3  ;;  %s315_s30 = sshll.u32 %s488_s9, 9  ;;  %v172_v0 = vld [vmem:[%s148_s5] sm:$0xff]  ;;  %v173_v1 = vld [vmem:[%s148_s5 + $0x8] sm:$0xff] }
  0x3c   : > { %s206_s29 = sshll.u32 %s166_s27, 4  ;;  %v174_v2 = vld [vmem:[%s148_s5 + $0x10] sm:$0xff]  ;;  %s639_s13 = scalar_lea.hbm %s688_s1, %s315_s30  ;;  %180 = vst [vmem:[%s166_s27] sm:$0xff] %v172_v0  ;;  %181 = vst [vmem:[%s166_s27 + $0x8] sm:$0xff] %v173_v1  ;;  %v175_v3 = vld [vmem:[%s148_s5 + $0x18] sm:$0xff]  ;;  %s634_s29 = int_to_ptr.vmem [resolvable:$true] %s206_s29 }
  0x3d   : > { %182 = vst [vmem:[%s166_s27 + $0x10] sm:$0xff] %v174_v2  ;;  %v176_v4 = vld [vmem:[%s148_s5 + $0x20] sm:$0xff]  ;;  %v177_v5 = vld [vmem:[%s148_s5 + $0x28] sm:$0xff]  ;;  %183 = vst [vmem:[%s166_s27 + $0x18] sm:$0xff] %v175_v3  ;;  %s189_s9 = scalar_lea.sflag [#allocation4], %s625_s28  ;;  %s414_s18 = scalar_lea.vmem %s634_s29, 1024 }
  0x3e   : > { %184 = vst [vmem:[%s166_s27 + $0x20] sm:$0xff] %v176_v4  ;;  %185 = vst [vmem:[%s166_s27 + $0x28] sm:$0xff] %v177_v5  ;;  %v178_v6 = vld [vmem:[%s148_s5 + $0x30] sm:$0xff]  ;;  %v179_v7 = vld [vmem:[%s148_s5 + $0x38] sm:$0xff]  ;;  %p415_p8 = scmp.ne.s32.totalorder %s634_s29, %s414_s18  ;;  %p695_p9 = scmp.ne.s32.totalorder %s692_s19, 0 }
  0x3f   : > { %186 = vst [vmem:[%s166_s27 + $0x30] sm:$0xff] %v178_v6  ;;  %187 = vst [vmem:[%s166_s27 + $0x38] sm:$0xff] %v179_v7  ;;  %s502_s15 = smov [#allocation5]  }
  0x40   : > { %p416_p11 = pnand %p415_p8, %p695_p9  ;;  %s418_s16 = sshll.u32 %s502_s15, 4  ;;  %s419_s16 = int_to_ptr.vmem [resolvable:$false] %s418_s16 }
  0x41   : > { %s420_s17 = scalar_lea.vmem %s419_s16, 2048  ;;  %p421_p10 = scmp.lt.s32.totalorder %s634_s29, %s419_s16 }
  0x42   : > { %p417_p13 = pneg %p416_p11  ;;  %p422_p12 = scmp.lt.s32.totalorder %s420_s17, %s414_s18 }
  0x44   : > { %p423_p0 = por %p422_p12, %p421_p10 }
  0x46   : > { %p424_p2 = pnand %p423_p0, %p417_p13 }
  0x48   : > { %427 = shalt.err (!%p424_p2)
}
  0x49   : > { %s428_s22 = scalar_lea.hbm %s639_s13, 1024  ;;  %s432_s25 = scalar_lea.hbm %s688_s1, 4096 }
  0x4a   : > { %p429_p4 = scmp.ne.s32.totalorder %s639_s13, %s428_s22  ;;  %p433_p1 = scmp.lt.u32.totalorder %s639_s13, %s688_s1 }
  0x4b   : > { %p434_p3 = scmp.lt.u32.totalorder %s432_s25, %s428_s22  ;;  %p436_p8 = scmp.lt.u32.totalorder %s428_s22, %s639_s13 }
  0x4c   : > { %p430_p5 = pnand %p429_p4, %p695_p9 }
  0x4d   : > { %p435_p7 = por %p434_p3, %p433_p1 }
  0x4e   : > { %p431_p6 = pneg %p430_p5 }
  0x4f   : > { %p437_p11 = por %p436_p8, %p435_p7 }
  0x51   : > { %p438_p13 = pnand %p437_p11, %p431_p6 }
  0x53   : > { %441 = shalt.err (!%p438_p13)
}
  0x54   : > { %s503_s4 = smov 512   ;;  %s504_s5 = smov 2048  }
  0x55   : > { %s505_s27 = smov 32  }
  0x56   : > { %318 = dma.vmem_to_hbm [thread:$0]  (%p695_p9), %s634_s29, 1024, %s639_s13, %s189_s9, %s503_s4, %s504_s5, %s505_s27  }
  0x57 PF: > { %p329_p10 = scmp.ge.s32.totalorder %s496_s11, 2  ;;  %s221_s30 = sand.u32 1, %s476_s6  }
  0x58   : > { %p696_p12 = scmp.ne.s32.totalorder %s693_s21, 0  ;;  %s222_s2 = scalar_lea.sflag [#allocation4], %s221_s30 }
  0x5a   : > { %p325_p0 = pnand %p329_p10, %p696_p12 }
  0x5c   : > { %471 = dma.done.wait (!%p325_p0), %s222_s2, 1024  }
  0x5d   : > { %473 = vsyncadd (!%p325_p0), %s222_s2, 4294966272  ;;  %s17_s11 = sadd.s32 1, %s496_s11   ;;  %s697_s6 = smov %s480_s7 }
  0x5e   : > { %p14_p2 = scmp.ge.s32.totalorder %s17_s11, 6   ;;  %s698_s7 = smov %s484_s8 }
  0x5f   : > { %s699_s8 = smov %s572_s20  ;;  %s700_s9 = smov %s492_s10 }
  0x60   : > { %s701_s10 = smov %s703_s14  ;;  %16 = sbr.rel (!%p14_p2) target bundleno = 6 (0x6), region = 69 }
  0x67   :  { %227 = vsyncpa [#allocation3], 1 }
  0x68   :  { %229 = vsyncpa [#allocation3 + $0x1], 1 }
  0x69   :  { %230 = vsyncpa [#allocation4], 1 }
  0x6a   :  { %232 = vsyncpa [#allocation4 + $0x1], 1 }

</bundles_post_ra>
